<compile_context>
chip_gen: v7x
topology: tpu7x:2x2x1
jax: 0.10.0
libtpu: 0.0.40
codegen_flags: <defaults>
</compile_context>

<pallas_src>
import jax
import jax.numpy as jnp
from jax.experimental import pallas as pl
from jax.experimental.pallas import tpu as pltpu

_MIB = 1 << 20


def _bn_affine_kernel(x_ref, sb_ref, o_ref):
    # x_ref : (tile_rows, tile_cols)  input tile (native dtype)
    # sb_ref: (tile_rows, 2) f32      col 0 = per-row scale, col 1 = per-row bias
    # o_ref : (tile_rows, tile_cols)  output tile
    x = x_ref[...].astype(jnp.float32)
    sb = sb_ref[...]
    scale = sb[:, 0:1]   # (tile_rows, 1)
    bias = sb[:, 1:2]    # (tile_rows, 1)
    o_ref[...] = (x * scale + bias).astype(o_ref.dtype)


def _vmem_capacity_bytes():
    try:
        return int(pltpu.get_tpu_info().vmem_capacity_bytes)
    except Exception:
        return 64 * _MIB  # conservative: assume the smallest (v7x) VMEM


def _choose_tiles(rows, cols, itemsize):
    """Pick (tile_rows, tile_cols, vmem_limit_bytes), generation-aware.

    Blocks carry a few MiB of input each (amortizes ~0.35 us/grid-step), and
    2x double-buffered (in + out) blocks stay well inside VMEM on every
    generation (v5e/v6e 128 MiB, v7x 64 MiB).
    """
    vmem_cap = _vmem_capacity_bytes()
    if vmem_cap >= 100 * _MIB:          # v5e / v6e (128 MiB physical VMEM)
        block_budget = 8 * _MIB          # input bytes per block
        vmem_limit = 56 * _MIB
    else:                                # v7x (64 MiB physical VMEM)
        block_budget = 4 * _MIB
        vmem_limit = 40 * _MIB

    # ---- column (lane) tiling: bound block bytes even for huge H*W ----
    if 8 * cols * itemsize > block_budget:
        tile_cols = max(128, (block_budget // (8 * itemsize) // 128) * 128)
        tile_rows = 8 if rows >= 8 else rows
        return tile_rows, tile_cols, vmem_limit

    tile_cols = cols

    # ---- row (sublane) tiling ----
    if rows < 8:
        return rows, tile_cols, vmem_limit       # full extent: always legal

    tile_rows = max(8, (block_budget // max(1, cols * itemsize) // 8) * 8)
    # Never exceed the number of full 8-row groups; trailing rows land in a
    # partial edge block (grid uses cdiv), which is legal and cheap.
    tile_rows = min(tile_rows, max(8, (rows // 8) * 8))

    # Prefer >= 8 row blocks when the tensor is large enough: v7x shards the
    # "parallel" axis across 2 TensorCores and needs several blocks per core
    # for DMA/compute overlap.  Harmless on single-TC v5e/v6e.
    if rows >= 64:
        cap_for_8_blocks = ((rows // 8) // 8) * 8
        if cap_for_8_blocks >= 8:
            tile_rows = min(tile_rows, cap_for_8_blocks)

    # Best effort: even row-block count so both v7x cores get equal work.
    nrb = -(-rows // tile_rows)
    if nrb > 1 and nrb % 2 == 1:
        cand = max(8, ((-(-rows // (nrb + 1)) + 7) // 8) * 8)
        if (-(-rows // cand)) % 2 == 0:
            tile_rows = cand

    return tile_rows, tile_cols, vmem_limit


def batchnorm_forward(x_nchw, gamma, beta, running_mean, running_var, epsilon=0.001):
    """Matches BatchNorm.forward: NCHW in, NCHW out, per-channel affine."""
    N, C, H, W = x_nchw.shape
    rows, cols = N * C, H * W

    # Free reshape (no transpose): row r of x2d is channel (r % C) of image (r // C).
    x2d = x_nchw.reshape(rows, cols)

    # Fold the 4 parameter vectors into per-channel scale/bias, in float32:
    #   y = gamma * (x - mean) / sqrt(var + eps) + beta = x * scale + bias
    g32 = gamma.astype(jnp.float32)
    b32 = beta.astype(jnp.float32)
    m32 = running_mean.astype(jnp.float32)
    v32 = running_var.astype(jnp.float32)
    scale_c = g32 * jax.lax.rsqrt(v32 + jnp.float32(epsilon))   # (C,)
    bias_c = b32 - m32 * scale_c                                 # (C,)

    # One fused (rows, 2) param array (col 0 = scale, col 1 = bias per row).
    # Its block index only depends on the row-block, so it is not re-DMA'd
    # across the inner (column) grid axis.
    sb = jnp.stack([jnp.tile(scale_c, N), jnp.tile(bias_c, N)], axis=-1)

    tile_rows, tile_cols, vmem_limit = _choose_tiles(rows, cols, x2d.dtype.itemsize)
    grid = (pl.cdiv(rows, tile_rows), pl.cdiv(cols, tile_cols))

    out2d = pl.pallas_call(
        _bn_affine_kernel,
        out_shape=jax.ShapeDtypeStruct((rows, cols), x2d.dtype),
        grid_spec=pltpu.PrefetchScalarGridSpec(
            num_scalar_prefetch=0,
            grid=grid,
            in_specs=[
                pl.BlockSpec((tile_rows, tile_cols), lambda i, j: (i, j)),
                pl.BlockSpec((tile_rows, 2), lambda i, j: (i, 0)),
            ],
            out_specs=pl.BlockSpec((tile_rows, tile_cols), lambda i, j: (i, j)),
        ),
        compiler_params=pltpu.CompilerParams(
            dimension_semantics=("parallel", "parallel"),
            vmem_limit_bytes=int(vmem_limit),
        ),
    )(x2d, sb)

    return out2d.reshape(N, C, H, W)


if __name__ == "__main__":
    # Small shapes consistent with the module: batch=2, channels=4, spatial=16.
    N, C, H, W = 2, 4, 16, 16
    key = jax.random.PRNGKey(0)
    x = jax.random.normal(key, (N, C, H, W), dtype=jnp.float32)

    # Deterministic parameter init mirroring the PyTorch __init__:
    #   gamma = ones, beta = zeros, running_mean = ones, running_var = zeros.
    gamma = jnp.ones((C,), jnp.float32)
    beta = jnp.zeros((C,), jnp.float32)
    running_mean = jnp.ones((C,), jnp.float32)
    running_var = jnp.zeros((C,), jnp.float32)
    epsilon = 0.001

    y = batchnorm_forward(x, gamma, beta, running_mean, running_var, epsilon)
    y = jax.block_until_ready(y)

    # Reference (plain JAX, same math as the torch forward).
    xp = jnp.transpose(x, (0, 2, 3, 1))
    ref = gamma * (xp - running_mean) / jnp.sqrt(running_var + epsilon) + beta
    ref = jnp.transpose(ref, (0, 3, 1, 2))

    assert y.shape == x.shape and y.dtype == x.dtype
    assert jnp.allclose(y, ref, atol=1e-5, rtol=1e-5)
    print("KERNEL_OK")
</pallas_src>

<mosaic_0001>
module attributes {stable_mosaic.version = 11 : i64} {
  func.func @_bn_affine_kernel(%arg0: i32, %arg1: i32, %arg2: memref<8x256xf32, #tpu.memory_space<vmem>>, %arg3: memref<8x2xf32, #tpu.memory_space<vmem>>, %arg4: memref<8x256xf32, #tpu.memory_space<vmem>>) attributes {dimension_semantics = [#tpu.dimension_semantics<parallel>, #tpu.dimension_semantics<parallel>], iteration_bounds = array<i64: 1, 1>, scalar_prefetch = 0 : i64, scratch_operands = 0 : i64, tpu.core_type = #tpu.core_type<tc>, window_params = [{transform_indices = @transform_0, window_bounds = array<i64: 8, 256>}, {transform_indices = @transform_1, window_bounds = array<i64: 8, 2>}, {transform_indices = @transform_2, window_bounds = array<i64: 8, 256>}]} {
    %c0 = arith.constant 0 : index
    %c0_0 = arith.constant 0 : index
    %0 = vector.load %arg2[%c0, %c0_0] : memref<8x256xf32, #tpu.memory_space<vmem>>, vector<8x256xf32>
    %c0_1 = arith.constant 0 : index
    %c0_2 = arith.constant 0 : index
    %1 = vector.load %arg3[%c0_1, %c0_2] : memref<8x2xf32, #tpu.memory_space<vmem>>, vector<8x2xf32>
    %2 = vector.extract_strided_slice %1 {offsets = [0, 0], sizes = [8, 1], strides = [1, 1]} : vector<8x2xf32> to vector<8x1xf32>
    %3 = vector.extract_strided_slice %1 {offsets = [0, 1], sizes = [8, 1], strides = [1, 1]} : vector<8x2xf32> to vector<8x1xf32>
    %4 = vector.broadcast %2 : vector<8x1xf32> to vector<8x256xf32>
    %5 = arith.mulf %0, %4 : vector<8x256xf32>
    %6 = vector.broadcast %3 : vector<8x1xf32> to vector<8x256xf32>
    %7 = arith.addf %5, %6 : vector<8x256xf32>
    %c0_3 = arith.constant 0 : index
    %c0_4 = arith.constant 0 : index
    %8 = vector.load %arg4[%c0_3, %c0_4] : memref<8x256xf32, #tpu.memory_space<vmem>>, vector<8x256xf32>
    tpu.vector_store %arg4[%c0_3, %c0_4], %7 {strides = array<i32>} : memref<8x256xf32, #tpu.memory_space<vmem>>, vector<8x256xf32>,
    return
  }
  func.func @transform_0(%arg0: i32, %arg1: i32) -> (i32, i32) {
    %c0_i32 = arith.constant 0 : i32
    return %arg0, %arg1 : i32, i32
  }
  func.func @transform_1(%arg0: i32, %arg1: i32) -> (i32, i32) {
    %c0_i32 = arith.constant 0 : i32
    %c0_i32_0 = arith.constant 0 : i32
    return %arg0, %c0_i32 : i32, i32
  }
  func.func @transform_2(%arg0: i32, %arg1: i32) -> (i32, i32) {
    %c0_i32 = arith.constant 0 : i32
    return %arg0, %arg1 : i32, i32
  }
}

</mosaic_0001>

<bundles_post_ra>
// kernel: tpu_custom_call.1
= control target key start
LH: loop header
LB: loop body
LE: loop exit
PB: predicated region body
PF: predicated region fallthrough
CT: control target
= control target key end

     0   :  { %7 = vsyncpa [#allocation3], 0  ;;  %s157_s0 = inlined_call_operand.hbm [shape: f32[8,256], index: 0, kind: input, shape index: {}]   ;;  %s158_s1 = inlined_call_operand.vmem [shape: f32[8,2], index: 1, kind: input, shape index: {}]   ;;  %s159_s2 = inlined_call_operand.hbm [shape: f32[8,256], index: 2, kind: output, shape index: {}]  }
   0x1   :  { %8 = vsyncpa [#allocation4], 0  ;;  %s111_s9 = smov [#allocation2]   ;;  %s63_s13 = scalar_lea.hbm %s157_s0, 256 }
   0x2   :  { %s15_s10 = sshll.u32 %s111_s9, 4  ;;  %p64_p0 = scmp.ne.s32.totalorder %s157_s0, %s63_s13  ;;  %s16_s10 = int_to_ptr.vmem [resolvable:$true] %s15_s10 }
   0x3   :  { %p67_p1 = scmp.lt.u32.totalorder %s63_s13, %s157_s0 }
   0x5   :  { %p69_p2 = pnand %p67_p1, %p64_p0 }
   0x7   :  { %72 = shalt.err (!%p69_p2)
}
   0x8   :  { %s73_s18 = scalar_lea.vmem %s16_s10, 256  ;;  %p78_p4 = scmp.lt.s32.totalorder %s16_s10, %s16_s10 }
   0x9   :  { %p74_p3 = scmp.ne.s32.totalorder %s16_s10, %s73_s18  ;;  %p79_p5 = scmp.lt.s32.totalorder %s73_s18, %s73_s18 }
   0xb   :  { %p80_p6 = por %p79_p5, %p78_p4 }
   0xd   :  { %p81_p7 = pnand %p80_p6, %p74_p3 }
   0xf   :  { %84 = shalt.err (!%p81_p7)
}
  0x10   :  { %18 = dma.hbm_to_vmem [thread:$0]  %s157_s0, 256, %s16_s10, [#allocation3]  }
  0x11   :  { %107 = dma.done.wait [#allocation3], 256  }
  0x12   :  { %108 = vsyncadd [#allocation3], 4294967040  ;;  %v112_v0 = vmov 0   ;;  %v26_v1 = vld [vmem:[%s158_s1] sm:$0xff]  ;;  %v113_v2 = vmov 1   ;;  %v25_v5 = vld [vmem:[#allocation2 + $0x8] sm:$0xff] }
  0x13   :  { %61 = vset.pattern.permute.xlu0 %v112_v0  ;;  %v24_v4 = vld [vmem:[#allocation2] sm:$0xff]  ;;  %s114_s23 = smov [#allocation5]  }
  0x14   :  { %29 = vperm.xlu0 %61, %v26_v1   ;;  %s48_s24 = sshll.u32 %s114_s23, 4  ;;  %s49_s24 = int_to_ptr.vmem [resolvable:$true] %s48_s24 }
  0x15   :  { %s85_s0 = scalar_lea.vmem %s49_s24, 256  ;;  %p90_p9 = scmp.lt.s32.totalorder %s49_s24, %s49_s24 }
  0x16   :  { %p86_p8 = scmp.ne.s32.totalorder %s49_s24, %s85_s0  ;;  %p91_p10 = scmp.lt.s32.totalorder %s85_s0, %s85_s0 }
  0x18   :  { %62 = vset.pattern.permute.xlu0 %v113_v2  ;;  %p92_p11 = por %p91_p10, %p90_p9 }
  0x19   :  { %35 = vperm.xlu0 %62, %v26_v1  }
  0x1a   :  { %p93_p12 = pnand %p92_p11, %p86_p8 }
  0x93   :  { %v30_v3 = vpop.permute.xlu0 %29 }
  0x94   :  { %v32_v6 = vmul.f32 %v30_v3, %v24_v4  ;;  %v33_v7 = vmul.f32 %v30_v3, %v25_v5 }
  0x98   :  { %v36_v8 = vpop.permute.xlu0 %35 }
  0x99   :  { %v38_v9 = vadd.f32 %v36_v8, %v32_v6  ;;  %v39_v10 = vadd.f32 %v36_v8, %v33_v7 }
  0x9b   :  { %40 = vst [vmem:[#allocation5] sm:$0xff] %v38_v9  ;;  %41 = vst [vmem:[#allocation5 + $0x8] sm:$0xff] %v39_v10 }
  0x9c   :  { %96 = shalt.err (!%p93_p12)
}
  0x9d   :  { %s97_s26 = scalar_lea.hbm %s159_s2, 256 }
  0x9e   :  { %p98_p13 = scmp.ne.s32.totalorder %s159_s2, %s97_s26  ;;  %p101_p0 = scmp.lt.u32.totalorder %s97_s26, %s159_s2 }
  0xa0   :  { %p103_p1 = pnand %p101_p0, %p98_p13 }
  0xa2   :  { %106 = shalt.err (!%p103_p1)
}
  0xa3   :  { %51 = dma.vmem_to_hbm [thread:$0]  %s49_s24, 256, %s159_s2, [#allocation4]  }
  0xa4   :  { %109 = dma.done.wait [#allocation4], 256  }
  0xa5   :  { %110 = vsyncadd [#allocation4], 4294967040 }
  0xa6   :  { %55 = vsyncpa [#allocation3], 1 }
  0xa7   :  { %56 = vsyncpa [#allocation4], 1 }

</bundles_post_ra>
